<compile_context>
chip_gen: v6e
topology: v6e:2x2x1
jax: 0.10.0
libtpu: 0.0.40
codegen_flags: <defaults>
</compile_context>

<pallas_src>
from functools import partial

import jax
import jax.numpy as jnp
import numpy as np
from jax.experimental import pallas as pl
from jax.experimental.pallas import tpu as pltpu


# ---------------------------------------------------------------------------
# Pallas kernel: whole JasperBlock forward for one lane-batched block per grid step
# ---------------------------------------------------------------------------
def _jasper_block_kernel(lens_ref,      # scalar-prefetch (B,) int32 in SMEM
                         x_ref,         # (1, C_in, BB*P + 4*pad) bf16, segment layout
                         w1_ref,        # (C_out, K*C_in)            bf16, BN scale folded in
                         w2r_ref,       # (C_out, K*C_out + C_in)    bf16, conv2 + res 1x1 fused
                         bias_ref,      # (C_out, 2) f32: [:,0]=b1, [:,1]=b2+bres
                         out_ref,       # (1, C_out, BB*P) out dtype
                         *, K, pad, BB, P):
    W_tot = x_ref.shape[2]            # BB*P + 4*pad
    N_o = out_ref.shape[2]            # BB*P   (final matmul N / store width)
    N_h = N_o + 2 * pad               # conv1 extended-output width (batched)

    base = pl.program_id(0) * BB

    # ---- per-lane mask thresholds on the lane-batched time axis (one iota per step,
    #      BB-1 integer selects per threshold; segment bb occupies lanes [bb*P, (bb+1)*P))
    iota = jax.lax.broadcasted_iota(jnp.int32, (1, W_tot), 1)
    zero = jnp.zeros((1, W_tot), jnp.int32)
    up_x = zero + (lens_ref[base] + 2 * pad)      # x kept where lane < seg_start + lens + 2*pad
    lo_h = zero + pad                             # h kept where seg_start + pad <= lane
    up_h = zero + (lens_ref[base] + pad)          #           and lane < seg_start + lens + pad
    for bb in range(1, BB):                       # BB is small and static
        l = lens_ref[base + bb]
        in_seg = iota >= bb * P
        up_x = jnp.where(in_seg, bb * P + l + 2 * pad, up_x)
        lo_h = jnp.where(in_seg, bb * P + pad, lo_h)
        up_h = jnp.where(in_seg, bb * P + l + pad, up_h)

    # ---- MaskedConv1d input mask, applied in bf16 (zeroing is exact)
    xm = jnp.where(iota < up_x, x_ref[0], 0.0)                       # (C_in, W_tot) bf16

    # ---- conv1: all K taps x all BB batch elements -> ONE MXU matmul (im2col on the
    #      contraction axis); lane slices are shared by the whole batch block.
    stack1 = jnp.concatenate([xm[:, k:k + N_h] for k in range(K)], axis=0)   # (K*C_in, N_h) bf16
    h = jnp.dot(w1_ref[...], stack1, preferred_element_type=jnp.float32)     # (C_out, N_h) f32
    h = jnp.clip(h + bias_ref[:, 0:1], 0.0, 20.0)   # folded BN shift + Hardtanh(0,20); Dropout = id

    # ---- re-mask by lens: this zeroes t >= lens, realizes conv2's 'same' zero padding,
    #      and kills the inter-segment garbage columns.  Epilogue stays f32; the bf16
    #      cast only feeds the next matmul.
    iota_h = iota[:, :N_h]
    mask_h = (iota_h >= lo_h[:, :N_h]) & (iota_h < up_h[:, :N_h])
    hm = jnp.where(mask_h, h.astype(jnp.bfloat16), 0.0)              # (C_out, N_h) bf16

    # ---- conv2 (K taps) + residual 1x1 fused into ONE matmul (contraction K*C_out + C_in)
    stack2 = jnp.concatenate(
        [hm[:, k:k + N_o] for k in range(K)] + [xm[:, 2 * pad:2 * pad + N_o]],
        axis=0)                                                      # (K*C_out + C_in, N_o) bf16
    o = jnp.dot(w2r_ref[...], stack2, preferred_element_type=jnp.float32)    # (C_out, N_o) f32

    # residual add folded into the matmul; combined BN shifts; final Hardtanh; full-block store
    out_ref[0] = jnp.clip(o + bias_ref[:, 1:2], 0.0, 20.0).astype(out_ref.dtype)


def _grid_steps_for_device():
    """One grid step per TensorCore: v5e/v6e have 1 TC per chip, v7x has 2."""
    try:
        kind = jax.devices()[0].device_kind.lower()
    except Exception:
        return 1
    return 2 if "v7" in kind else 1


# ---------------------------------------------------------------------------
# Wrapper: mimics JasperBlock.forward(([x], lens)) -> ([out], lens)   (eval mode)
# ---------------------------------------------------------------------------
def jasper_block_forward(xs, lens, params, *, batch_block=None, out_dtype=jnp.float32):
    x = xs[-1]                                           # (B, C_in, T)  NCT layout
    B, C_in, T = x.shape
    W1, W2, Wr = params["W1"], params["W2"], params["Wres"]
    K, C_out, _ = W1.shape
    pad = K // 2                                         # get_same_padding(k, 1, 1)

    # ---- host-side prep (layout / precision glue, pure XLA ops) ----
    # Fold eval-mode BatchNorm scale into conv weights, fuse conv2 + residual 1x1 into
    # one weight matrix, pack the two remaining shift vectors into one (C_out, 2) block.
    w1f = (W1 * params["s1"][None]).transpose(1, 0, 2).reshape(C_out, K * C_in)
    w2f = (W2 * params["s2"][None]).transpose(1, 0, 2).reshape(C_out, K * C_out)
    wrf = Wr * params["sres"]
    w2r = jnp.concatenate([w2f, wrf], axis=1).astype(jnp.bfloat16)   # (C_out, K*C_out + C_in)
    w1f = w1f.astype(jnp.bfloat16)
    bias = jnp.concatenate([params["b1"], params["b2"] + params["bres"]], axis=1)  # (C_out, 2)

    # One grid step per TensorCore; each step handles a lane-batched block of BB elements.
    if batch_block is None:
        steps = _grid_steps_for_device()
        BB = B // steps if B % steps == 0 else B
    else:
        BB = batch_block if B % batch_block == 0 else B
    G = B // BB

    # Lane-batched layout: each batch element becomes a period-P lane segment
    # [2*pad zeros | T data | 2*pad zeros]; the BB segments of a grid block are
    # concatenated along lanes plus a 4*pad zero tail, so every conv tap is one static
    # lane slice shared by the whole block and conv2's zero padding comes from a mask.
    P = T + 4 * pad                      # P >= T + 3*pad keeps every kept tap read in-segment
    W_tot = BB * P + 4 * pad
    seg = jnp.pad(x, ((0, 0), (0, 0), (2 * pad, 2 * pad)))           # (B, C_in, P)
    x_cat = seg.reshape(G, BB, C_in, P).transpose(0, 2, 1, 3).reshape(G, C_in, BB * P)
    x_cat = jnp.pad(x_cat, ((0, 0), (0, 0), (0, 4 * pad))).astype(jnp.bfloat16)
    lens32 = lens.astype(jnp.int32)

    kernel = partial(_jasper_block_kernel, K=K, pad=pad, BB=BB, P=P)
    grid_spec = pltpu.PrefetchScalarGridSpec(
        num_scalar_prefetch=1,
        grid=(G,),
        in_specs=[
            pl.BlockSpec((1, C_in, W_tot), lambda g, L: (g, 0, 0)),
            # TODO(synk): for real Jasper sizes (C ~ 256-1024, T in the thousands) mark
            # these constant weight/bias specs single-buffered (pipeline_mode=pl.Buffered(1)),
            # add C_out and time grid axes (time blocks with a K-1 halo), and set
            # pltpu.CompilerParams(vmem_limit_bytes=...) so the working set fits v7x's 64 MiB.
            pl.BlockSpec((C_out, K * C_in), lambda g, L: (0, 0)),
            pl.BlockSpec((C_out, K * C_out + C_in), lambda g, L: (0, 0)),
            pl.BlockSpec((C_out, 2), lambda g, L: (0, 0)),
        ],
        out_specs=pl.BlockSpec((1, C_out, BB * P), lambda g, L: (g, 0, 0)),
    )

    out = pl.pallas_call(
        kernel,
        out_shape=jax.ShapeDtypeStruct((G, C_out, BB * P), out_dtype),
        grid_spec=grid_spec,
        compiler_params=pltpu.CompilerParams(dimension_semantics=("parallel",)),
    )(lens32, x_cat, w1f, w2r, bias)

    # Un-batch the lanes and drop the per-segment halo / garbage columns.
    out = out.reshape(G, C_out, BB, P)[:, :, :, :T]
    out = out.transpose(0, 2, 1, 3).reshape(B, C_out, T)

    # stride=1, dilation=1 -> get_seq_len(lens) == lens.
    return [out], lens


# ---------------------------------------------------------------------------
# Pure-JAX reference (PyTorch semantics), evaluated at the same MXU precision the
# kernel uses (bf16 inputs, f32 accumulation) so the comparison stays tight.
# ---------------------------------------------------------------------------
def _conv1d(x, w, pad):  # x: (B,C,T), w: (O,I,K)
    return jax.lax.conv_general_dilated(
        x, w, window_strides=(1,), padding=[(pad, pad)],
        dimension_numbers=("NCH", "OIH", "NCH"),
        preferred_element_type=jnp.float32)


def ref_forward(x, lens, params):
    B, C_in, T = x.shape
    K = params["W1"].shape[0]
    pad = K // 2
    mask = (jnp.arange(T)[None, :] < lens[:, None])[:, None, :]          # (B,1,T)

    w1 = (params["W1"] * params["s1"][None]).astype(jnp.bfloat16)        # BN scale folded
    w2 = (params["W2"] * params["s2"][None]).astype(jnp.bfloat16)
    wr = (params["Wres"] * params["sres"]).astype(jnp.bfloat16)

    xb = jnp.where(mask, x, 0.0).astype(jnp.bfloat16)
    h = _conv1d(xb, jnp.transpose(w1, (1, 2, 0)), pad) + params["b1"][None]
    h = jnp.clip(h, 0.0, 20.0)

    hb = jnp.where(mask, h, 0.0).astype(jnp.bfloat16)
    o = _conv1d(hb, jnp.transpose(w2, (1, 2, 0)), pad) + params["b2"][None]

    r = _conv1d(xb, wr[:, :, None], 0) + params["bres"][None]
    return jnp.clip(o + r, 0.0, 20.0)


# ---------------------------------------------------------------------------
def make_params(key, C_in, C_out, K):
    ks = jax.random.split(key, 9)
    eps = 1e-3  # BatchNorm1d eps used by JasperBlock

    def bn(ka, kb):
        gamma = jax.random.uniform(ka, (C_out,), minval=0.5, maxval=1.5)
        beta = jax.random.normal(kb, (C_out,)) * 0.1
        mean = jax.random.normal(ka, (C_out,)) * 0.1
        var = jax.random.uniform(kb, (C_out,), minval=0.5, maxval=1.5)
        scale = gamma / jnp.sqrt(var + eps)
        shift = beta - mean * scale
        return scale.reshape(C_out, 1), shift.reshape(C_out, 1)

    s1, b1 = bn(ks[3], ks[4])
    s2, b2 = bn(ks[5], ks[6])
    sres, bres = bn(ks[7], ks[8])
    return {
        "W1": jax.random.normal(ks[0], (K, C_out, C_in), jnp.float32) * 0.1,
        "W2": jax.random.normal(ks[1], (K, C_out, C_out), jnp.float32) * 0.1,
        "Wres": jax.random.normal(ks[2], (C_out, C_in), jnp.float32) * 0.1,
        "s1": s1, "b1": b1, "s2": s2, "b2": b2, "sres": sres, "bres": bres,
    }


if __name__ == "__main__":
    B, C_in, C_out, T, K = 4, 16, 32, 128, 5

    key = jax.random.PRNGKey(0)
    kx, kp = jax.random.split(key)
    x = jax.random.normal(kx, (B, C_in, T), jnp.float32)
    lens = jnp.array([T, 3 * T // 4, T // 2, 37], dtype=jnp.int32)
    params = make_params(kp, C_in, C_out, K)

    outs, lens_out = jasper_block_forward([x], lens, params)
    out = jax.block_until_ready(outs[-1])

    ref = jax.block_until_ready(ref_forward(x, lens, params))
    # Tolerance covers rare bf16 double-rounding differences between the fused kernel
    # and the XLA-conv reference (both use bf16 MXU inputs with f32 accumulation).
    np.testing.assert_allclose(np.asarray(out), np.asarray(ref), atol=2e-2, rtol=1e-2)
    assert out.shape == (B, C_out, T)
    assert np.array_equal(np.asarray(lens_out), np.asarray(lens))

    print("KERNEL_OK")
</pallas_src>

<mosaic_0001>
module attributes {stable_mosaic.version = 11 : i64} {
  func.func @_jasper_block_kernel(%arg0: i32, %arg1: memref<4xi32, #tpu.memory_space<smem>>, %arg2: memref<1x16x552xbf16, #tpu.memory_space<vmem>>, %arg3: memref<32x80xbf16, #tpu.memory_space<vmem>>, %arg4: memref<32x176xbf16, #tpu.memory_space<vmem>>, %arg5: memref<32x2xf32, #tpu.memory_space<vmem>>, %arg6: memref<1x32x544xf32, #tpu.memory_space<vmem>>) attributes {dimension_semantics = [#tpu.dimension_semantics<parallel>], iteration_bounds = array<i64: 1>, scalar_prefetch = 1 : i64, scratch_operands = 0 : i64, tpu.core_type = #tpu.core_type<tc>, window_params = [{transform_indices = @transform_0, window_bounds = array<i64: 1, 16, 552>}, {pipeline_mode = #tpu.pipeline_mode<synchronous>, transform_indices = @transform_1, window_bounds = array<i64: 32, 80>}, {pipeline_mode = #tpu.pipeline_mode<synchronous>, transform_indices = @transform_2, window_bounds = array<i64: 32, 176>}, {pipeline_mode = #tpu.pipeline_mode<synchronous>, transform_indices = @transform_3, window_bounds = array<i64: 32, 2>}, {transform_indices = @transform_4, window_bounds = array<i64: 1, 32, 544>}]} {
    %c4_i32 = arith.constant 4 : i32
    %0 = arith.muli %arg0, %c4_i32 : i32
    %1 = tpu.iota {dimensions = array<i32: 1>} : vector<1x552xi32>
    %c0_i32 = arith.constant 0 : i32
    %2 = vector.broadcast %c0_i32 : i32 to vector<1x552xi32>
    %3 = arith.index_cast %0 : i32 to index
    %4 = memref.load %arg1[%3] : memref<4xi32, #tpu.memory_space<smem>>
    %c4_i32_0 = arith.constant 4 : i32
    %5 = arith.addi %4, %c4_i32_0 : i32
    %6 = vector.broadcast %5 : i32 to vector<1x552xi32>
    %7 = arith.addi %2, %6 : vector<1x552xi32>
    %c2_i32 = arith.constant 2 : i32
    %8 = vector.broadcast %c2_i32 : i32 to vector<1x552xi32>
    %9 = arith.addi %2, %8 : vector<1x552xi32>
    %10 = arith.index_cast %0 : i32 to index
    %11 = memref.load %arg1[%10] : memref<4xi32, #tpu.memory_space<smem>>
    %c2_i32_1 = arith.constant 2 : i32
    %12 = arith.addi %11, %c2_i32_1 : i32
    %13 = vector.broadcast %12 : i32 to vector<1x552xi32>
    %14 = arith.addi %2, %13 : vector<1x552xi32>
    %c1_i32 = arith.constant 1 : i32
    %15 = arith.addi %0, %c1_i32 : i32
    %16 = arith.index_cast %15 : i32 to index
    %17 = memref.load %arg1[%16] : memref<4xi32, #tpu.memory_space<smem>>
    %c136_i32 = arith.constant 136 : i32
    %18 = vector.broadcast %c136_i32 : i32 to vector<1x552xi32>
    %19 = arith.cmpi sge, %1, %18 : vector<1x552xi32>
    %c136_i32_2 = arith.constant 136 : i32
    %20 = arith.addi %c136_i32_2, %17 : i32
    %c4_i32_3 = arith.constant 4 : i32
    %21 = arith.addi %20, %c4_i32_3 : i32
    %22 = vector.broadcast %21 : i32 to vector<1x552xi32>
    %23 = arith.select %19, %22, %7 : vector<1x552xi1>, vector<1x552xi32>
    %c138_i32 = arith.constant 138 : i32
    %24 = vector.broadcast %c138_i32 : i32 to vector<1x552xi32>
    %25 = arith.select %19, %24, %9 : vector<1x552xi1>, vector<1x552xi32>
    %c136_i32_4 = arith.constant 136 : i32
    %26 = arith.addi %c136_i32_4, %17 : i32
    %c2_i32_5 = arith.constant 2 : i32
    %27 = arith.addi %26, %c2_i32_5 : i32
    %28 = vector.broadcast %27 : i32 to vector<1x552xi32>
    %29 = arith.select %19, %28, %14 : vector<1x552xi1>, vector<1x552xi32>
    %c2_i32_6 = arith.constant 2 : i32
    %30 = arith.addi %0, %c2_i32_6 : i32
    %31 = arith.index_cast %30 : i32 to index
    %32 = memref.load %arg1[%31] : memref<4xi32, #tpu.memory_space<smem>>
    %c272_i32 = arith.constant 272 : i32
    %33 = vector.broadcast %c272_i32 : i32 to vector<1x552xi32>
    %34 = arith.cmpi sge, %1, %33 : vector<1x552xi32>
    %c272_i32_7 = arith.constant 272 : i32
    %35 = arith.addi %c272_i32_7, %32 : i32
    %c4_i32_8 = arith.constant 4 : i32
    %36 = arith.addi %35, %c4_i32_8 : i32
    %37 = vector.broadcast %36 : i32 to vector<1x552xi32>
    %38 = arith.select %34, %37, %23 : vector<1x552xi1>, vector<1x552xi32>
    %c274_i32 = arith.constant 274 : i32
    %39 = vector.broadcast %c274_i32 : i32 to vector<1x552xi32>
    %40 = arith.select %34, %39, %25 : vector<1x552xi1>, vector<1x552xi32>
    %c272_i32_9 = arith.constant 272 : i32
    %41 = arith.addi %c272_i32_9, %32 : i32
    %c2_i32_10 = arith.constant 2 : i32
    %42 = arith.addi %41, %c2_i32_10 : i32
    %43 = vector.broadcast %42 : i32 to vector<1x552xi32>
    %44 = arith.select %34, %43, %29 : vector<1x552xi1>, vector<1x552xi32>
    %c3_i32 = arith.constant 3 : i32
    %45 = arith.addi %0, %c3_i32 : i32
    %46 = arith.index_cast %45 : i32 to index
    %47 = memref.load %arg1[%46] : memref<4xi32, #tpu.memory_space<smem>>
    %c408_i32 = arith.constant 408 : i32
    %48 = vector.broadcast %c408_i32 : i32 to vector<1x552xi32>
    %49 = arith.cmpi sge, %1, %48 : vector<1x552xi32>
    %c408_i32_11 = arith.constant 408 : i32
    %50 = arith.addi %c408_i32_11, %47 : i32
    %c4_i32_12 = arith.constant 4 : i32
    %51 = arith.addi %50, %c4_i32_12 : i32
    %52 = vector.broadcast %51 : i32 to vector<1x552xi32>
    %53 = arith.select %49, %52, %38 : vector<1x552xi1>, vector<1x552xi32>
    %c410_i32 = arith.constant 410 : i32
    %54 = vector.broadcast %c410_i32 : i32 to vector<1x552xi32>
    %55 = arith.select %49, %54, %40 : vector<1x552xi1>, vector<1x552xi32>
    %c408_i32_13 = arith.constant 408 : i32
    %56 = arith.addi %c408_i32_13, %47 : i32
    %c2_i32_14 = arith.constant 2 : i32
    %57 = arith.addi %56, %c2_i32_14 : i32
    %58 = vector.broadcast %57 : i32 to vector<1x552xi32>
    %59 = arith.select %49, %58, %44 : vector<1x552xi1>, vector<1x552xi32>
    %60 = arith.cmpi slt, %1, %53 : vector<1x552xi32>
    %c0 = arith.constant 0 : index
    %c0_15 = arith.constant 0 : index
    %c0_16 = arith.constant 0 : index
    %61 = vector.load %arg2[%c0, %c0_15, %c0_16] : memref<1x16x552xbf16, #tpu.memory_space<vmem>>, vector<1x16x552xbf16>
    %62 = vector.shape_cast %61 : vector<1x16x552xbf16> to vector<16x552xbf16>
    %cst = arith.constant 0.000000e+00 : f32
    %63 = arith.truncf %cst : f32 to bf16
    %64 = vector.shape_cast %60 : vector<1x552xi1> to vector<1x552xi1>
    %65 = vector.broadcast %64 : vector<1x552xi1> to vector<16x552xi1>
    %66 = vector.broadcast %63 : bf16 to vector<16x552xbf16>
    %67 = arith.select %65, %62, %66 : vector<16x552xi1>, vector<16x552xbf16>
    %68 = vector.extract_strided_slice %67 {offsets = [0, 0], sizes = [16, 548], strides = [1, 1]} : vector<16x552xbf16> to vector<16x548xbf16>
    %69 = vector.extract_strided_slice %67 {offsets = [0, 1], sizes = [16, 548], strides = [1, 1]} : vector<16x552xbf16> to vector<16x548xbf16>
    %70 = vector.extract_strided_slice %67 {offsets = [0, 2], sizes = [16, 548], strides = [1, 1]} : vector<16x552xbf16> to vector<16x548xbf16>
    %71 = vector.extract_strided_slice %67 {offsets = [0, 3], sizes = [16, 548], strides = [1, 1]} : vector<16x552xbf16> to vector<16x548xbf16>
    %72 = vector.extract_strided_slice %67 {offsets = [0, 4], sizes = [16, 548], strides = [1, 1]} : vector<16x552xbf16> to vector<16x548xbf16>
    %73 = tpu.concatenate %68, %69, %70, %71, %72 in 0 : vector<16x548xbf16>, vector<16x548xbf16>, vector<16x548xbf16>, vector<16x548xbf16>, vector<16x548xbf16> -> vector<80x548xbf16>
    %c0_17 = arith.constant 0 : index
    %c0_18 = arith.constant 0 : index
    %74 = vector.load %arg3[%c0_17, %c0_18] : memref<32x80xbf16, #tpu.memory_space<vmem>>, vector<32x80xbf16>
    %cst_19 = arith.constant dense<0.000000e+00> : vector<32x548xf32>
    %75 = tpu.matmul %74, %73, %cst_19 {dimension_numbers = #tpu.dot_dimension_numbers<[1], [0], [0], [1], [0, 0, 1, 1], [], []>} : vector<32x80xbf16>, vector<80x548xbf16>, vector<32x548xf32> -> vector<32x548xf32>
    %c0_20 = arith.constant 0 : index
    %c0_21 = arith.constant 0 : index
    %76 = vector.load %arg5[%c0_20, %c0_21] : memref<32x2xf32, #tpu.memory_space<vmem>>, vector<32x1xf32>
    %77 = vector.broadcast %76 : vector<32x1xf32> to vector<32x548xf32>
    %78 = arith.addf %75, %77 : vector<32x548xf32>
    %cst_22 = arith.constant 0.000000e+00 : f32
    %cst_23 = arith.constant 2.000000e+01 : f32
    %79 = vector.broadcast %cst_22 : f32 to vector<32x548xf32>
    %80 = arith.maximumf %79, %78 : vector<32x548xf32>
    %81 = vector.broadcast %cst_23 : f32 to vector<32x548xf32>
    %82 = arith.minimumf %81, %80 : vector<32x548xf32>
    %83 = vector.extract_strided_slice %1 {offsets = [0, 0], sizes = [1, 548], strides = [1, 1]} : vector<1x552xi32> to vector<1x548xi32>
    %84 = vector.extract_strided_slice %55 {offsets = [0, 0], sizes = [1, 548], strides = [1, 1]} : vector<1x552xi32> to vector<1x548xi32>
    %85 = arith.cmpi sge, %83, %84 : vector<1x548xi32>
    %86 = vector.extract_strided_slice %59 {offsets = [0, 0], sizes = [1, 548], strides = [1, 1]} : vector<1x552xi32> to vector<1x548xi32>
    %87 = arith.cmpi slt, %83, %86 : vector<1x548xi32>
    %88 = arith.andi %85, %87 : vector<1x548xi1>
    %89 = arith.truncf %82 : vector<32x548xf32> to vector<32x548xbf16>
    %cst_24 = arith.constant 0.000000e+00 : f32
    %90 = arith.truncf %cst_24 : f32 to bf16
    %91 = vector.shape_cast %88 : vector<1x548xi1> to vector<1x548xi1>
    %92 = vector.broadcast %91 : vector<1x548xi1> to vector<32x548xi1>
    %93 = vector.broadcast %90 : bf16 to vector<32x548xbf16>
    %94 = arith.select %92, %89, %93 : vector<32x548xi1>, vector<32x548xbf16>
    %95 = vector.extract_strided_slice %94 {offsets = [0, 0], sizes = [32, 544], strides = [1, 1]} : vector<32x548xbf16> to vector<32x544xbf16>
    %96 = vector.extract_strided_slice %94 {offsets = [0, 1], sizes = [32, 544], strides = [1, 1]} : vector<32x548xbf16> to vector<32x544xbf16>
    %97 = vector.extract_strided_slice %94 {offsets = [0, 2], sizes = [32, 544], strides = [1, 1]} : vector<32x548xbf16> to vector<32x544xbf16>
    %98 = vector.extract_strided_slice %94 {offsets = [0, 3], sizes = [32, 544], strides = [1, 1]} : vector<32x548xbf16> to vector<32x544xbf16>
    %99 = vector.extract_strided_slice %94 {offsets = [0, 4], sizes = [32, 544], strides = [1, 1]} : vector<32x548xbf16> to vector<32x544xbf16>
    %100 = vector.extract_strided_slice %67 {offsets = [0, 4], sizes = [16, 544], strides = [1, 1]} : vector<16x552xbf16> to vector<16x544xbf16>
    %101 = tpu.concatenate %95, %96, %97, %98, %99, %100 in 0 : vector<32x544xbf16>, vector<32x544xbf16>, vector<32x544xbf16>, vector<32x544xbf16>, vector<32x544xbf16>, vector<16x544xbf16> -> vector<176x544xbf16>
    %c0_25 = arith.constant 0 : index
    %c0_26 = arith.constant 0 : index
    %102 = vector.load %arg4[%c0_25, %c0_26] : memref<32x176xbf16, #tpu.memory_space<vmem>>, vector<32x176xbf16>
    %cst_27 = arith.constant dense<0.000000e+00> : vector<32x544xf32>
    %103 = tpu.matmul %102, %101, %cst_27 {dimension_numbers = #tpu.dot_dimension_numbers<[1], [0], [0], [1], [0, 0, 1, 1], [], []>} : vector<32x176xbf16>, vector<176x544xbf16>, vector<32x544xf32> -> vector<32x544xf32>
    %c0_28 = arith.constant 0 : index
    %c1 = arith.constant 1 : index
    %104 = vector.load %arg5[%c0_28, %c1] : memref<32x2xf32, #tpu.memory_space<vmem>>, vector<32x1xf32>
    %105 = vector.broadcast %104 : vector<32x1xf32> to vector<32x544xf32>
    %106 = arith.addf %103, %105 : vector<32x544xf32>
    %cst_29 = arith.constant 0.000000e+00 : f32
    %cst_30 = arith.constant 2.000000e+01 : f32
    %107 = vector.broadcast %cst_29 : f32 to vector<32x544xf32>
    %108 = arith.maximumf %107, %106 : vector<32x544xf32>
    %109 = vector.broadcast %cst_30 : f32 to vector<32x544xf32>
    %110 = arith.minimumf %109, %108 : vector<32x544xf32>
    %c0_31 = arith.constant 0 : index
    %c0_32 = arith.constant 0 : index
    %c0_33 = arith.constant 0 : index
    %111 = vector.load %arg6[%c0_31, %c0_32, %c0_33] : memref<1x32x544xf32, #tpu.memory_space<vmem>>, vector<1x32x544xf32>
    %112 = vector.shape_cast %111 : vector<1x32x544xf32> to vector<32x544xf32>
    %113 = vector.shape_cast %110 : vector<32x544xf32> to vector<1x32x544xf32>
    tpu.vector_store %arg6[%c0_31, %c0_32, %c0_33], %113 {strides = array<i32>} : memref<1x32x544xf32, #tpu.memory_space<vmem>>, vector<1x32x544xf32>,
    return
  }
  func.func @transform_0(%arg0: i32, %arg1: memref<4xi32, #tpu.memory_space<smem>>) -> (i32, i32, i32) {
    %c0_i32 = arith.constant 0 : i32
    %c0_i32_0 = arith.constant 0 : i32
    %c0_i32_1 = arith.constant 0 : i32
    return %arg0, %c0_i32, %c0_i32_0 : i32, i32, i32
  }
  func.func @transform_1(%arg0: i32, %arg1: memref<4xi32, #tpu.memory_space<smem>>) -> (i32, i32) {
    %c0_i32 = arith.constant 0 : i32
    %c0_i32_0 = arith.constant 0 : i32
    %c0_i32_1 = arith.constant 0 : i32
    return %c0_i32, %c0_i32_0 : i32, i32
  }
  func.func @transform_2(%arg0: i32, %arg1: memref<4xi32, #tpu.memory_space<smem>>) -> (i32, i32) {
    %c0_i32 = arith.constant 0 : i32
    %c0_i32_0 = arith.constant 0 : i32
    %c0_i32_1 = arith.constant 0 : i32
    return %c0_i32, %c0_i32_0 : i32, i32
  }
  func.func @transform_3(%arg0: i32, %arg1: memref<4xi32, #tpu.memory_space<smem>>) -> (i32, i32) {
    %c0_i32 = arith.constant 0 : i32
    %c0_i32_0 = arith.constant 0 : i32
    %c0_i32_1 = arith.constant 0 : i32
    return %c0_i32, %c0_i32_0 : i32, i32
  }
  func.func @transform_4(%arg0: i32, %arg1: memref<4xi32, #tpu.memory_space<smem>>) -> (i32, i32, i32) {
    %c0_i32 = arith.constant 0 : i32
    %c0_i32_0 = arith.constant 0 : i32
    %c0_i32_1 = arith.constant 0 : i32
    return %arg0, %c0_i32, %c0_i32_0 : i32, i32, i32
  }
}

</mosaic_0001>

<bundles_post_ra>
// kernel: tpu_custom_call.1
= control target key start
LH: loop header
LB: loop body
LE: loop exit
PB: predicated region body
PF: predicated region fallthrough
CT: control target
= control target key end

     0   :  { %s1780_s0 = inlined_call_operand.vmem [shape: s32[4], index: 0, kind: input, shape index: {}]   ;;  %s1781_s1 = inlined_call_operand.hbm [shape: bf16[1,16,552], index: 1, kind: input, shape index: {}]   ;;  %s1782_s2 = inlined_call_operand.hbm [shape: bf16[32,80], index: 2, kind: input, shape index: {}]   ;;  %s1783_s3 = inlined_call_operand.vmem [shape: bf16[32,176], index: 3, kind: input, shape index: {}]   ;;  %s1784_s4 = inlined_call_operand.vmem [shape: f32[32,2], index: 4, kind: input, shape index: {}]   ;;  %s1785_s5 = inlined_call_operand.hbm [shape: f32[1,32,544], index: 5, kind: output, shape index: {}]  }
   0x1   :  { %s10_s20 = sshll.u32 %s1780_s0, 4  ;;  %s11_s20 = int_to_ptr.vmem [resolvable:$true] %s10_s20 }
   0x2   :  { %s1121_s21 = scalar_lea.vmem %s11_s20, 16  ;;  %p1126_p1 = scmp.lt.s32.totalorder %s11_s20, %s11_s20 }
   0x3   :  { %p1122_p0 = scmp.ne.s32.totalorder %s11_s20, %s1121_s21  ;;  %p1127_p2 = scmp.lt.s32.totalorder %s1121_s21, %s1121_s21 }
   0x5   :  { %p1128_p3 = por %p1127_p2, %p1126_p1 }
   0x7   :  { %p1129_p4 = pnand %p1128_p3, %p1122_p0 }
   0x9   :  { %1132 = shalt.err (!%p1129_p4)  }
   0xa   :  { %s1201_s22 = smov [#allocation3]  }
   0xb   :  { %13 = dma.vmem_to_smem %s11_s20, 16, %s1201_s22, [#allocation2] }
   0xc   :  { %1193 = dma.done.wait [#allocation2], 16 }
   0xd   :  { %1194 = vsyncadd [#allocation2], 4294967280 }
   0xe   :  { %15 = sfence }
   0xf   :  { %16 = vsyncpa [#allocation5], 0 }
  0x10   :  { %17 = vsyncpa [#allocation8], 0 }
  0x11   :  { %18 = vsyncpa [#allocation6], 0  ;;  %s1202_s23 = smov [#allocation4]  }
  0x12   :  { %s24_s24 = sshll.u32 %s1202_s23, 4  ;;  %s25_s24 = int_to_ptr.vmem [resolvable:$true] %s24_s24 }
  0x13   :  { %s1141_s0 = scalar_lea.vmem %s25_s24, 640  ;;  %p1146_p6 = scmp.lt.s32.totalorder %s25_s24, %s25_s24 }
  0x14   :  { %p1142_p5 = scmp.ne.s32.totalorder %s25_s24, %s1141_s0  ;;  %p1147_p7 = scmp.lt.s32.totalorder %s1141_s0, %s1141_s0 }
  0x16   :  { %p1148_p8 = por %p1147_p7, %p1146_p6 }
  0x18   :  { %p1149_p9 = pnand %p1148_p8, %p1142_p5 }
  0x1a   :  { %1152 = shalt.err (!%p1149_p9)
}
  0x1b   :  { %s1203_s25 = smov 320   ;;  %s1204_s26 = smov 20  }
  0x1c   :  { %30 = dma.hbm_to_vmem [thread:$0]  %s1781_s1, 640, %s25_s24, [#allocation5], %s1203_s25, %s1203_s25, %s1204_s26  }
  0x1d   :  { %s1205_s29 = smov [#allocation7]  }
  0x1e   :  { %s36_s30 = sshll.u32 %s1205_s29, 4  ;;  %s37_s30 = int_to_ptr.vmem [resolvable:$true] %s36_s30 }
  0x1f   :  { %s1161_s6 = scalar_lea.vmem %s37_s30, 256  ;;  %p1166_p11 = scmp.lt.s32.totalorder %s37_s30, %s37_s30 }
  0x20   :  { %p1162_p10 = scmp.ne.s32.totalorder %s37_s30, %s1161_s6  ;;  %p1167_p12 = scmp.lt.s32.totalorder %s1161_s6, %s1161_s6 }
  0x22   :  { %p1168_p13 = por %p1167_p12, %p1166_p11 }
  0x24   :  { %p1169_p0 = pnand %p1168_p13, %p1162_p10 }
  0x26   :  { %1172 = shalt.err (!%p1169_p0)
}
  0x27   :  { %s1206_s7 = smov 64   ;;  %s1207_s8 = smov 4  }
  0x28   :  { %42 = dma.hbm_to_vmem [thread:$0]  %s1782_s2, 256, %s37_s30, [#allocation8], %s1206_s7, %s1206_s7, %s1207_s8  }
  0x29   :  { %1195 = dma.done.wait [#allocation5], 640  }
  0x2a   :  { %1196 = vsyncadd [#allocation5], 4294966656 }
  0x2b   :  { %1197 = dma.done.wait [#allocation8], 256  }
  0x2c   :  { %1198 = vsyncadd [#allocation8], 4294967040  ;;  %v57_v0 = vlaneseq  ;;  %s1259_s1 = sld [smem:[#allocation3]]  ;;  %v151_v6 = vld [vmem:[#allocation4] sm:$0xff]  ;;  %v154_v9 = vld [vmem:[#allocation4 + $0x14] sm:$0xff]  ;;  %s1208_s17 = smov 124  }
  0x2d   :  { %s1264_s11 = sld [smem:[#allocation3 + $0x1]]  ;;  %v152_v14 = vld [vmem:[#allocation4 + $0x8] sm:$0xff]  ;;  %v155_v15 = vld [vmem:[#allocation4 + $0x1c] sm:$0xff]  ;;  %s1209_s18 = smov 125   ;;  %v153_v24 = vld [vmem:[#allocation4 + $0x10] sm:$0xf] }
  0x2e   :  { %v1262_v1 = vand.u32 127, %v57_v0  ;;  %s1266_s12 = sld [smem:[#allocation3 + $0x2]]  ;;  %s1210_s19 = smov 126   ;;  %v156_v25 = vld [vmem:[#allocation4 + $0x24] sm:$0xf]  ;;  %v1211_v26 = vmov 0  }
  0x2f   :  { %s1277_s2 = sld [smem:[#allocation3 + $0x3]]  ;;  %359 = vmatprep.mubr.bf16.mxu0 %v1211_v26  ;;  %1110 = vset.pattern.permute.xlu1 %v1211_v26  ;;  %s1212_s20 = smov 127   ;;  %v1356_v31 = vld [vmem:[%s1784_s4 + $0x18] sm:$0xff]  ;;  %v1361_v32 = vld [vmem:[%s1784_s4 + $0x10] sm:$0xff]  ;;  %v1368_v33 = vld [vmem:[%s1784_s4] sm:$0xff]  ;;  %vm272_vm11 = vcmask 1014784  }
  0x30   :  { %v1269_v2 = vadd.s32 128, %v1262_v1  ;;  %v1272_v3 = vadd.s32 256, %v1262_v1  ;;  %v1275_v4 = vadd.s32 384, %v1262_v1  ;;  %v1311_v23 = vadd.s32 512, %v1262_v1  ;;  %1109 = vset.pattern.permute.xlu0 %v1211_v26  ;;  %v1373_v34 = vld [vmem:[%s1784_s4 + $0x8] sm:$0xff] }
  0x31   :  { %vm252_vm12 = vcmask 1022976   ;;  %vm232_vm13 = vcmask 1031168   ;;  %vm212_vm14 = vcmask 1039360   ;;  %v1113_v58 = vld [vmem:[#allocation7] sm:$0xff]   ;;  %vm320_vm15 = vcmask 654336  }
  0x32   :  { %s64_s13 = sadd.s32 4, %s1259_s1  ;;  %vm71_vm0 = vcmp.ge.s32.totalorder %v1269_v2, 136  ;;  %vm98_vm1 = vcmp.ge.s32.totalorder %v1272_v3, 272  ;;  %vm125_vm2 = vcmp.ge.s32.totalorder %v1275_v4, 408  ;;  %s66_s4 = sadd.s32 2, %s1259_s1 }
  0x33   :  { %v65_v5 = vstv %s64_s13  ;;  %s75_s14 = sadd.s32 140, %s1264_s11  ;;  %s87_s28 = sadd.s32 138, %s1264_s11 }
  0x34   :  { %v76_v7 = vstv %s75_s14  ;;  %vm146_vm3 = vcmp.lt.s32.totalorder %v1262_v1, %v65_v5  ;;  %s101_s15 = sadd.s32 276, %s1266_s12  ;;  %s113_s29 = sadd.s32 274, %s1266_s12 }
  0x35   :  { %v78_v8 = vsel %vm71_vm0, %v76_v7, %v65_v5  ;;  %v102_v10 = vstv %s101_s15  ;;  %s127_s16 = sadd.s32 412, %s1277_s2  ;;  %s139_s30 = sadd.s32 410, %s1277_s2 }
  0x36   :  { %vm147_vm4 = vcmp.lt.s32.totalorder %v1269_v2, %v78_v8  ;;  %v105_v11 = vsel %vm98_vm1, %v102_v10, %v76_v7  ;;  %v128_v12 = vstv %s127_s16  ;;  %v1114_v8 = vld [vmem:[#allocation7 + $0x8] sm:$0xff]  }
  0x37   :  { %vm167_vm5 = vmpackc.low %vm147_vm4, %vm146_vm3  ;;  %v132_v13 = vsel %vm125_vm2, %v128_v12, %v102_v10  ;;  %vm148_vm6 = vcmp.lt.s32.totalorder %v1272_v3, %v105_v11  ;;  %vm150_vm9 = vcmp.lt.s32.totalorder %v1311_v23, %v128_v12  ;;  %vm522_vm3 = vcmp.ge.s32.totalorder %v1262_v1, 2 }
  0x38   :  { %v170_v16 = vsel %vm167_vm5, %v151_v6, 0  ;;  %v173_v17 = vsel %vm167_vm5, %v154_v9, 0  ;;  %vm149_vm7 = vcmp.lt.s32.totalorder %v1275_v4, %v132_v13  ;;  %vm169_vm10 = vmpackc.low %vm150_vm9, %vm150_vm9 }
  0x39   :  { %v1296_v18 = vcombine.high %v170_v16, %v173_v17  ;;  %v1298_v19 = vcombine.low %v170_v16, %v173_v17  ;;  %vm168_vm8 = vmpackc.low %vm149_vm7, %vm148_vm6  ;;  %v172_v27 = vsel %vm169_vm10, %v153_v24, 0  ;;  %v175_v28 = vsel %vm169_vm10, %v156_v25, 0 }
  0x3a   :  { %v171_v20 = vsel %vm168_vm8, %v152_v14, 0  ;;  %v174_v21 = vsel %vm168_vm8, %v155_v15, 0  ;;  %v1335_v30 = vcombine.low %v172_v27, %v175_v28  ;;  %v67_v14 = vstv %s66_s4 }
  0x3b   :  { %264 = vrot.lane.b32.xlu0 %v1296_v18, %s1208_s17  ;;  %262 = vrot.lane.b32.xlu1 %v1298_v19, %s1208_s17  ;;  %v1304_v22 = vcombine.low %v171_v20, %v174_v21  ;;  %v1333_v29 = vcombine.high %v171_v20, %v174_v21  ;;  %v88_v15 = vstv %s87_s28  ;;  %v1213_v16 = vmov 2  }
  0x3c   :  { %v83_v17 = vsel %vm71_vm0, 138, %v1213_v16  ;;  %vm527_vm4 = vcmp.lt.s32.totalorder %v1262_v1, %v67_v14 }
  0x3d   :  { %vm523_vm5 = vcmp.ge.s32.totalorder %v1269_v2, %v83_v17  ;;  %vm532_vm7 = vmand %vm522_vm3, %vm527_vm4 }
  0x3f   :  { %266 = vrot.lane.b32.xlu0 %v1304_v22, %s1208_s17  ;;  %244 = vrot.lane.b32.xlu1 %v1296_v18, %s1209_s18 }
  0x43   :  { %246 = vrot.lane.b32.xlu0 %v1304_v22, %s1209_s18  ;;  %242 = vrot.lane.b32.xlu1 %v1298_v19, %s1209_s18 }
  0x47   :  { %224 = vrot.lane.b32.xlu0 %v1296_v18, %s1210_s19  ;;  %226 = vrot.lane.b32.xlu1 %v1304_v22, %s1210_s19 }
  0x4b   :  { %222 = vrot.lane.b32.xlu0 %v1298_v19, %s1210_s19  ;;  %204 = vrot.lane.b32.xlu1 %v1296_v18, %s1212_s20 }
  0x4f   :  { %206 = vrot.lane.b32.xlu0 %v1304_v22, %s1212_s20  ;;  %202 = vrot.lane.b32.xlu1 %v1298_v19, %s1212_s20 }
  0x53   :  { %268 = vrot.lane.b32.xlu0 %v1333_v29, %s1208_s17  ;;  %270 = vrot.lane.b32.xlu1 %v1335_v30, %s1208_s17 }
  0x57   :  { %248 = vrot.lane.b32.xlu0 %v1333_v29, %s1209_s18  ;;  %250 = vrot.lane.b32.xlu1 %v1335_v30, %s1209_s18 }
  0x5b   :  { %228 = vrot.lane.b32.xlu0 %v1333_v29, %s1210_s19  ;;  %230 = vrot.lane.b32.xlu1 %v1335_v30, %s1210_s19 }
  0x5f   :  { %208 = vrot.lane.b32.xlu0 %v1333_v29, %s1212_s20  ;;  %210 = vrot.lane.b32.xlu1 %v1335_v30, %s1212_s20 }
  0x63   :  { %307 = vperm.xlu1 %1110, %v1356_v31   ;;  %302 = vperm.xlu0 %1109, %v1361_v32  }
  0x67   :  { %292 = vperm.xlu1 %1110, %v1368_v33   ;;  %297 = vperm.xlu0 %1109, %v1373_v34  }
  0xad   :  { %v265_v35 = vpop.permute.xlu0 %264  ;;  %v263_v36 = vpop.permute.xlu1 %262 }
  0xae   :  { %v1382_v40 = vsel %vm272_vm11, %v263_v36, %v265_v35 }
  0xb1   :  { %v267_v37 = vpop.permute.xlu0 %266  ;;  %v245_v38 = vpop.permute.xlu1 %244 }
  0xb2   :  { %v1378_v39 = vsel %vm272_vm11, %v265_v35, %v267_v37 }
  0xb3   :  { %333 = vmatprep.subr.bf16.mxu0 %v1378_v39 }
  0xb4   :  { %334 = vmatpush1.bf16.msra.mxu0 %v1382_v40 }
  0xb5   :  { %v247_v41 = vpop.permute.xlu0 %246  ;;  %v243_v42 = vpop.permute.xlu1 %242 }
  0xb6   :  { %v254_v43 = vsel %vm252_vm12, %v245_v38, %v247_v41  ;;  %v253_v44 = vsel %vm252_vm12, %v243_v42, %v245_v38 }
  0xb7   :  { %335 = vmatprep.subr.bf16.mxu0 %v254_v43 }
  0xb8   :  { %336 = vmatpush1.bf16.msra.mxu0 %v253_v44 }
  0xb9   :  { %v225_v45 = vpop.permute.xlu0 %224  ;;  %v227_v46 = vpop.permute.xlu1 %226 }
  0xba   :  { %v234_v47 = vsel %vm232_vm13, %v225_v45, %v227_v46 }
  0xbb   :  { %337 = vmatprep.subr.bf16.mxu0 %v234_v47 }
  0xbd   :  { %v223_v48 = vpop.permute.xlu0 %222  ;;  %v205_v49 = vpop.permute.xlu1 %204 }
  0xbe   :  { %v233_v50 = vsel %vm232_vm13, %v223_v48, %v225_v45 }
  0xbf   :  { %338 = vmatpush1.bf16.msra.mxu0 %v233_v50 }
  0xc1   :  { %v207_v51 = vpop.permute.xlu0 %206  ;;  %v203_v52 = vpop.permute.xlu1 %202 }
  0xc2   :  { %v214_v53 = vsel %vm212_vm14, %v205_v49, %v207_v51  ;;  %v213_v54 = vsel %vm212_vm14, %v203_v52, %v205_v49 }
  0xc3   :  { %339 = vmatprep.subr.bf16.mxu0 %v214_v53 }
  0xc4   :  { %340 = vmatpush1.bf16.msra.mxu0 %v213_v54 }
  0xc5   :  { %v269_v55 = vpop.permute.xlu0 %268  ;;  %341 = vmatprep.subr.bf16.mxu0 %v1296_v18  ;;  %v1392_v56 = vpop.permute.xlu1 %270  ;;  %v90_v18 = vsel %vm71_vm0, %v88_v15, %v67_v14 }
  0xc6   :  { %v1396_v57 = vsel %vm272_vm11, %v269_v55, %v1392_v56  ;;  %v1402_v62 = vsel %vm272_vm11, %v267_v37, %v269_v55  ;;  %vm528_vm6 = vcmp.lt.s32.totalorder %v1269_v2, %v90_v18 }
  0xc7   :  { %vm533_vm8 = vmand %vm523_vm5, %vm528_vm6 }
  0xc8   :  { %342 = vmatpush1.bf16.msra.mxu0 %v1298_v19  ;;  %vm557_vm0 = vmpackc.low %vm533_vm8, %vm532_vm7 }
  0xc9   :  { %v249_v59 = vpop.permute.xlu0 %248  ;;  %386 = vmatprep.subr.bf16.mxu0 %v1396_v57  ;;  %v251_v60 = vpop.permute.xlu1 %250 }
  0xca   :  { %v256_v61 = vsel %vm252_vm12, %v249_v59, %v251_v60  ;;  %v255_v7 = vsel %vm252_vm12, %v247_v41, %v249_v59  ;;  %v114_v59 = vstv %s113_s29 }
  0xcb   :  { %1049 = vmatmul.mubr.msk.bf16.vlgmr.msra.gmra.mxu0 %vm320_vm15, %v1113_v58 }
  0xcc   :  { %387 = vmatpush1.bf16.msra.mxu0 %v1402_v62  ;;  %369 = vmatprep.mubr.bf16.mxu0 %v1211_v26 }
  0xcd   :  { %v229_v63 = vpop.permute.xlu0 %228  ;;  %388 = vmatprep.subr.bf16.mxu0 %v256_v61  ;;  %v231_v5 = vpop.permute.xlu1 %230 }
  0xce   :  { %v236_v6 = vsel %vm232_vm13, %v229_v63, %v231_v5  ;;  %v235_v12 = vsel %vm232_vm13, %v227_v46, %v229_v63  ;;  %v1473_v63 = vstv %s139_s30 }
  0xcf   :  { %v144_v17 = vsel %vm125_vm2, %v1473_v63, %v114_v59  ;;  %vm531_vm8 = vcmp.lt.s32.totalorder %v1311_v23, %v1473_v63 }
  0xd0   :  { %389 = vmatpush1.bf16.msra.mxu0 %v255_v7  ;;  %vm530_vm4 = vcmp.lt.s32.totalorder %v1275_v4, %v144_v17 }
  0xd1   :  { %v209_v9 = vpop.permute.xlu0 %208  ;;  %390 = vmatprep.subr.bf16.mxu0 %v236_v6  ;;  %v211_v10 = vpop.permute.xlu1 %210 }
  0xd2   :  { %v216_v11 = vsel %vm212_vm14, %v209_v9, %v211_v10  ;;  %v215_v13 = vsel %vm212_vm14, %v207_v51, %v209_v9 }
  0xd3   :  { %1050 = vmatmul.mubr.msk.bf16.gmra.mxu0 %vm320_vm15, %v1114_v8 }
  0xd4   :  { %391 = vmatpush1.bf16.msra.mxu0 %v235_v12  ;;  %412 = vmatprep.mubr.bf16.mxu0 %v1211_v26 }
  0xd5   :  { %392 = vmatprep.subr.bf16.mxu0 %v216_v11  ;;  %v1215_v11 = vmov 274  }
  0xd6   :  { %v137_v12 = vsel %vm125_vm2, 410, %v1215_v11 }
  0xd7   :  { %vm525_vm3 = vcmp.ge.s32.totalorder %v1275_v4, %v137_v12 }
  0xd8   :  { %393 = vmatpush1.bf16.msra.mxu0 %v215_v13  ;;  %vm535_vm5 = vmand %vm525_vm3, %vm530_vm4 }
  0xd9   :  { %394 = vmatprep.subr.bf16.mxu0 %v1333_v29  ;;  %v560_v29 = vsel %vm557_vm0, 65537, %v1211_v26  ;;  %vm559_vm0 = vmpackc.low %vm531_vm8, %vm531_vm8 }
  0xdc   :  { %395 = vmatpush1.bf16.msra.mxu0 %v1304_v22  ;;  %v1442_v22 = vshrl.u32 %v57_v0, 7 }
  0xdd   :  { %1076 = vmatprep.subr.bf16.mxu0 %v1392_v56 }
  0xde   :  { %v1431_v19 = vpop.permute.xlu1 %307  ;;  %v1437_v20 = vpop.permute.xlu0 %302  ;;  %v1448_v1 = vsub.s32 0, %v1442_v22  ;;  %v569_v38 = vsub.s32 4, %v1442_v22 }
  0xdf   :  { %1051 = vmatmul.mubr.msk.bf16.vlgmr.msra.gmra.mxu0 %vm320_vm15, %v1113_v58 }
  0xe0   :  { %1077 = vmatpush3.bf16.msra.mxu0 %v1392_v56  ;;  %422 = vmatprep.mubr.bf16.mxu0 %v1211_v26  ;;  %v566_v36 = vrot.slane %v560_v29, %v1448_v1  ;;  %v1464_v51 = vrot.slane %v560_v29, %v569_v38 }
  0xe1   :  { %1078 = vmatprep.subr.bf16.mxu0 %v251_v60 }
  0xe2   :  { %v1439_v21 = vpop.permute.xlu1 %292  ;;  %v1445_v28 = vpop.permute.xlu0 %297  ;;  %vm1458_vm9 = vcmp.ne.s16.totalorder %v566_v36, 0  ;;  %vm584_vm10 = vcmp.ne.s16.totalorder %v1464_v51, 0 }
  0xe4   :  { %1079 = vmatpush3.bf16.msra.mxu0 %v251_v60 }
  0xe5   :  { %1080 = vmatprep.subr.bf16.mxu0 %v231_v5 }
  0xe7   :  { %1052 = vmatmul.mubr.msk.bf16.gmra.mxu0 %vm320_vm15, %v1114_v8 }
  0xe8   :  { %1081 = vmatpush3.bf16.msra.mxu0 %v231_v5  ;;  %1086 = vmatprep.mubr.msk.bf16.mxu0 %vm320_vm15, %v1113_v58 }
  0xe9   :  { %1082 = vmatprep.subr.bf16.mxu0 %v211_v10 }
  0xec   :  { %1083 = vmatpush3.bf16.msra.mxu0 %v211_v10  ;;  %v117_v10 = vsel %vm98_vm1, %v114_v59, %v88_v15 }
  0xed   :  { %1084 = vmatprep.subr.bf16.mxu0 %v1335_v30 }
  0xf0   :  { %1085 = vmatpush3.bf16.msra.mxu0 %v1335_v30 }
  0xf3   :  { %1087 = vmatmul.mubr.msk.bf16.vlgmr.msra.gmra.mxu0 %vm320_vm15, %v1114_v8  ;;  %v1214_v8 = vmov 138   ;;  %vm529_vm15 = vcmp.lt.s32.totalorder %v1272_v3, %v117_v10 }
  0xf4   :  { %v110_v9 = vsel %vm98_vm1, 274, %v1214_v8 }
  0xf5   :  { %vm524_vm1 = vcmp.ge.s32.totalorder %v1272_v3, %v110_v9 }
  0xf6   :  { %vm1501_vm2 = vmand %vm524_vm1, %vm529_vm15  ;;  %vm798_vm1 = vcmask 392192  }
  0xf7   :  { %vm558_vm6 = vmpackc.low %vm535_vm5, %vm1501_vm2 }
 0x18b   :  { %v361_v24 = vpop.f32.mrf.mxu0 }
 0x18c   :  { %v362_v25 = vadd.f32 %v361_v24, %v1439_v21 }
 0x18d   :  { %v363_v27 = vpop.f32.mrf.mxu0 }
 0x18e   :  { %v364_v2 = vadd.f32 %v363_v27, %v1439_v21  ;;  %v482_v0 = vmax.f32 %v362_v25, 0.0 }
 0x18f   :  { %v365_v30 = vpop.f32.mrf.mxu0 }
 0x190   :  { %v366_v35 = vadd.f32 %v365_v30, %v1445_v28  ;;  %v483_v41 = vmax.f32 %v364_v2, 0.0  ;;  %v502_v45 = vmin.f32 %v482_v0, 20.0 }
 0x191   :  { %v367_v37 = vpop.f32.mrf.mxu0 }
 0x192   :  { %v487_v42 = vmax.f32 %v366_v35, 0.0  ;;  %v368_v43 = vadd.f32 %v367_v37, %v1445_v28  ;;  %v503_v52 = vmin.f32 %v483_v41, 20.0 }
 0x193   :  { %v371_v44 = vpop.f32.mrf.mxu0 }
 0x194   :  { %v507_v46 = vmin.f32 %v487_v42, 20.0  ;;  %v488_v47 = vmax.f32 %v368_v43, 0.0  ;;  %v372_v48 = vadd.f32 %v371_v44, %v1437_v20 }
 0x195   :  { %v373_v50 = vpop.f32.mrf.mxu0 }
 0x196   :  { %v537_v53 = vpack.c.bf16 %v507_v46, %v502_v45  ;;  %v508_v54 = vmin.f32 %v488_v47, 20.0  ;;  %v492_v55 = vmax.f32 %v372_v48, 0.0  ;;  %v374_v14 = vadd.f32 %v373_v50, %v1437_v20 }
 0x197   :  { %v375_v58 = vpop.f32.mrf.mxu0  ;;  %v561_v45 = vsel %vm558_vm6, 65537, %v1211_v26 }
 0x198   :  { %v1469_v60 = vsel %vm1458_vm9, %v537_v53, 0  ;;  %v1471_v61 = vpack.c.bf16 %v508_v54, %v503_v52  ;;  %v376_v5 = vadd.f32 %v375_v58, %v1431_v19  ;;  %v512_v13 = vmin.f32 %v492_v55, 20.0 }
 0x199   :  { %v377_v6 = vpop.f32.mrf.mxu0  ;;  %684 = vrot.lane.b32.xlu0 %v1469_v60, %s1209_s18  ;;  %v493_v15 = vmax.f32 %v374_v14, 0.0  ;;  %v574_v52 = vrot.slane %v561_v45, %v1448_v1 }
 0x19a   :  { %v378_v7 = vadd.f32 %v377_v6, %v1431_v19  ;;  %v497_v16 = vmax.f32 %v376_v5, 0.0  ;;  %v1493_v18 = vsel %vm584_vm10, %v1471_v61, 0 }
 0x19b   :  { %v513_v3 = vmin.f32 %v493_v15, 20.0  ;;  %vm585_vm7 = vcmp.ne.s16.totalorder %v574_v52, 0 }
 0x19c   :  { %v517_v24 = vmin.f32 %v497_v16, 20.0  ;;  %v498_v25 = vmax.f32 %v378_v7, 0.0 }
 0x19d   :  { %686 = vrot.lane.b32.xlu0 %v1493_v18, %s1209_s18 }
 0x19e   :  { %v542_v27 = vpack.c.bf16 %v517_v24, %v512_v13  ;;  %v518_v35 = vmin.f32 %v498_v25, 20.0 }
 0x19f   :  { %v414_v2 = vpop.f32.mrf.mxu0 }
 0x1a0   :  { %v1507_v30 = vsel %vm1458_vm9, %v542_v27, 0  ;;  %v415_v4 = vadd.f32 %v414_v2, %v1439_v21  ;;  %v1515_v41 = vpack.c.bf16 %v518_v35, %v513_v3 }
 0x1a1   :  { %v416_v0 = vpop.f32.mrf.mxu0  ;;  %694 = vrot.lane.b32.xlu1 %v1507_v30, %s1209_s18 }
 0x1a2   :  { %v484_v44 = vmax.f32 %v415_v4, 0.0  ;;  %v594_v50 = vsel %vm584_vm10, %v1515_v41, 0  ;;  %v417_v25 = vadd.f32 %v416_v0, %v1439_v21  ;;  %v1562_v4 = vrot.slane %v561_v45, %v569_v38 }
 0x1a3   :  { %v418_v36 = vpop.f32.mrf.mxu0  ;;  %v562_v45 = vsel %vm559_vm0, 65537, %v1211_v26 }
 0x1a4   :  { %v419_v37 = vadd.f32 %v418_v36, %v1445_v28  ;;  %v504_v53 = vmin.f32 %v484_v44, 20.0  ;;  %v485_v35 = vmax.f32 %v417_v25, 0.0  ;;  %vm586_vm9 = vcmp.ne.s16.totalorder %v1562_v4, 0 }
 0x1a5   :  { %v420_v42 = vpop.f32.mrf.mxu0  ;;  %656 = vrot.lane.b32.xlu1 %v1507_v30, %s1210_s19 }
 0x1a6   :  { %v489_v43 = vmax.f32 %v419_v37, 0.0  ;;  %v421_v16 = vadd.f32 %v420_v42, %v1445_v28 }
 0x1a7   :  { %v424_v46 = vpop.f32.mrf.mxu0 }
 0x1a8   :  { %v509_v47 = vmin.f32 %v489_v43, 20.0  ;;  %v425_v48 = vadd.f32 %v424_v46, %v1437_v20  ;;  %v490_v27 = vmax.f32 %v421_v16, 0.0  ;;  %v505_v43 = vmin.f32 %v485_v35, 20.0 }
 0x1a9   :  { %v426_v49 = vpop.f32.mrf.mxu0  ;;  %696 = vrot.lane.b32.xlu1 %v594_v50, %s1209_s18 }
 0x1aa   :  { %v539_v55 = vpack.c.bf16 %v509_v47, %v504_v53  ;;  %v494_v58 = vmax.f32 %v425_v48, 0.0  ;;  %v427_v14 = vadd.f32 %v426_v49, %v1437_v20  ;;  %v510_v36 = vmin.f32 %v490_v27, 20.0 }
 0x1ab   :  { %v428_v54 = vpop.f32.mrf.mxu0  ;;  %v582_v48 = vrot.slane %v562_v45, %v1448_v1 }
 0x1ac   :  { %v429_v59 = vadd.f32 %v428_v54, %v1431_v19  ;;  %v1528_v6 = vsel %vm585_vm7, %v539_v55, 0  ;;  %v514_v7 = vmin.f32 %v494_v58, 20.0  ;;  %v495_v15 = vmax.f32 %v427_v14, 0.0 }
 0x1ad   :  { %658 = vrot.lane.b32.xlu1 %v594_v50, %s1210_s19  ;;  %v430_v11 = vpop.f32.mrf.mxu0  ;;  %v1575_v38 = vpack.c.bf16 %v510_v36, %v505_v43  ;;  %vm587_vm15 = vcmp.ne.s16.totalorder %v582_v48, 0  ;;  %v1216_v58 = vmov 1  }
 0x1ae   :  { %v499_v5 = vmax.f32 %v429_v59, 0.0  ;;  %v431_v12 = vadd.f32 %v430_v11, %v1431_v19  ;;  %v515_v3 = vmin.f32 %v495_v15, 20.0  ;;  %1111 = vset.pattern.permute.xlu1 %v1216_v58  ;;  %1112 = vset.pattern.permute.xlu0 %v1216_v58 }
 0x1b0   :  { %v519_v8 = vmin.f32 %v499_v5, 20.0  ;;  %v500_v17 = vmax.f32 %v431_v12, 0.0 }
 0x1b1   :  { %688 = vrot.lane.b32.xlu1 %v1528_v6, %s1209_s18 }
 0x1b2   :  { %v544_v9 = vpack.c.bf16 %v519_v8, %v514_v7  ;;  %v520_v2 = vmin.f32 %v500_v17, 20.0 }
 0x1b3   :  { %v1088_v13 = vpop.f32.mrf.mxu0 }
 0x1b4   :  { %v1532_v10 = vsel %vm585_vm7, %v544_v9, 0  ;;  %v1564_v37 = vpack.c.bf16 %v520_v2, %v515_v3  ;;  %v476_v22 = vadd.f32 %v1088_v13, %v1437_v20 }
 0x1b5   :  { %650 = vrot.lane.b32.xlu1 %v1528_v6, %s1210_s19  ;;  %698 = vrot.lane.b32.xlu0 %v1532_v10, %s1209_s18  ;;  %v467_v24 = vpop.f32.mrf.mxu0 }
 0x1b6   :  { %v596_v23 = vsel %vm586_vm9, %v1564_v37, 0  ;;  %v496_v63 = vmax.f32 %v476_v22, 0.0  ;;  %v468_v20 = vadd.f32 %v467_v24, %v1439_v21 }
 0x1b7   :  { %v1089_v29 = vpop.f32.mrf.mxu0 }
 0x1b8   :  { %v479_v0 = vadd.f32 %v1089_v29, %v1431_v19  ;;  %v516_v21 = vmin.f32 %v496_v63, 20.0  ;;  %v486_v49 = vmax.f32 %v468_v20, 0.0 }
 0x1b9   :  { %620 = vrot.lane.b32.xlu1 %v594_v50, %s1212_s20  ;;  %648 = vrot.lane.b32.xlu0 %v1493_v18, %s1210_s19  ;;  %v470_v42 = vpop.f32.mrf.mxu0 }
 0x1ba   :  { %v501_v44 = vmax.f32 %v479_v0, 0.0  ;;  %v471_v19 = vadd.f32 %v470_v42, %v1445_v28  ;;  %v591_v28 = vsel %vm586_vm9, %v1575_v38, 0  ;;  %v506_v52 = vmin.f32 %v486_v49, 20.0 }
 0x1bc   :  { %v521_v46 = vmin.f32 %v501_v44, 20.0  ;;  %v491_v47 = vmax.f32 %v471_v19, 0.0 }
 0x1bd   :  { %618 = vrot.lane.b32.xlu1 %v1507_v30, %s1212_s20  ;;  %660 = vrot.lane.b32.xlu0 %v1532_v10, %s1210_s19 }
 0x1be   :  { %v546_v1 = vpack.c.bf16 %v521_v46, %v516_v21 }
 0x1c0   :  { %v1605_v53 = vsel %vm587_vm15, %v546_v1, 0 }
 0x1c1   :  { %612 = vrot.lane.b32.xlu1 %v1528_v6, %s1212_s20  ;;  %646 = vrot.lane.b32.xlu0 %v1469_v60, %s1210_s19 }
 0x1c5   :  { %734 = vrot.lane.b32.xlu1 %v594_v50, %s1208_s17  ;;  %622 = vrot.lane.b32.xlu0 %v1532_v10, %s1212_s20  ;;  %v511_v50 = vmin.f32 %v491_v47, 20.0 }
 0x1c7   :  { %v541_v54 = vpack.c.bf16 %v511_v50, %v506_v52  ;;  %v1687_v50 = vld [vmem:[%s1783_s3] ss:$8 sps:$4 sm:$0xff]  }
 0x1c9   :  { %732 = vrot.lane.b32.xlu1 %v1507_v30, %s1208_s17  ;;  %610 = vrot.lane.b32.xlu0 %v1493_v18, %s1212_s20  ;;  %v1610_v55 = vsel %vm587_vm15, %v541_v54, 0 }
 0x1cd   :  { %726 = vrot.lane.b32.xlu1 %v1528_v6, %s1208_s17  ;;  %608 = vrot.lane.b32.xlu0 %v1469_v60, %s1212_s20 }
 0x1d1   :  { %700 = vrot.lane.b32.xlu1 %v596_v23, %s1209_s18  ;;  %724 = vrot.lane.b32.xlu0 %v1493_v18, %s1208_s17  ;;  %v1596_v18 = vld [vmem:[%s1783_s3 + $0x4] ss:$8 sps:$4 sm:$0xff]  }
 0x1d2   :  { %1061 = vmatprep.mubr.msk.bf16.mxu1 %vm798_vm1, %v1596_v18  ;;  %1065 = vmatprep.mubr.msk.bf16.mxu0 %vm798_vm1, %v1596_v18 }
 0x1d5   :  { %690 = vrot.lane.b32.xlu1 %v591_v28, %s1209_s18  ;;  %736 = vrot.lane.b32.xlu0 %v1532_v10, %s1208_s17 }
 0x1d9   :  { %662 = vrot.lane.b32.xlu1 %v596_v23, %s1210_s19  ;;  %722 = vrot.lane.b32.xlu0 %v1469_v60, %s1208_s17 }
 0x1dd   :  { %652 = vrot.lane.b32.xlu1 %v591_v28, %s1210_s19  ;;  %702 = vrot.lane.b32.xlu0 %v1605_v53, %s1209_s18 }
 0x1e1   :  { %624 = vrot.lane.b32.xlu1 %v596_v23, %s1212_s20  ;;  %692 = vrot.lane.b32.xlu0 %v1610_v55, %s1209_s18 }
 0x1e5   :  { %614 = vrot.lane.b32.xlu1 %v591_v28, %s1212_s20  ;;  %664 = vrot.lane.b32.xlu0 %v1605_v53, %s1210_s19 }
 0x1e9   :  { %738 = vrot.lane.b32.xlu1 %v596_v23, %s1208_s17  ;;  %654 = vrot.lane.b32.xlu0 %v1610_v55, %s1210_s19 }
 0x1ed   :  { %728 = vrot.lane.b32.xlu1 %v591_v28, %s1208_s17  ;;  %626 = vrot.lane.b32.xlu0 %v1605_v53, %s1212_s20 }
 0x1f1   :  { %616 = vrot.lane.b32.xlu0 %v1610_v55, %s1212_s20  ;;  %765 = vperm.xlu1 %1111, %v1368_v33  }
 0x1f5   :  { %740 = vrot.lane.b32.xlu0 %v1605_v53, %s1208_s17  ;;  %773 = vperm.xlu1 %1111, %v1361_v32  }
 0x1f9   :  { %730 = vrot.lane.b32.xlu0 %v1610_v55, %s1208_s17  ;;  %777 = vperm.xlu1 %1111, %v1356_v31  }
 0x1fd   :  { %769 = vperm.xlu0 %1112, %v1373_v34  }
 0x20b   :  { %v685_v8 = vpop.permute.xlu0 %684 }
 0x20f   :  { %v687_v11 = vpop.permute.xlu0 %686 }
 0x210   :  { %v704_v17 = vsel %vm252_vm12, %v685_v8, %v687_v11 }
 0x213   :  { %v695_v59 = vpop.permute.xlu1 %694 }
 0x217   :  { %v657_v5 = vpop.permute.xlu1 %656 }
 0x21b   :  { %v697_v7 = vpop.permute.xlu1 %696 }
 0x21c   :  { %v708_v33 = vsel %vm252_vm12, %v695_v59, %v697_v7  ;;  %v1695_v59 = vld [vmem:[%s1783_s3 + $0x14] ss:$8 sps:$4 sm:$0xff]  }
 0x21f   :  { %v659_v9 = vpop.permute.xlu1 %658 }
 0x220   :  { %v670_v27 = vsel %vm232_vm13, %v657_v5, %v659_v9 }
 0x223   :  { %v1634_v12 = vpop.permute.xlu1 %688 }
 0x224   :  { %v705_v32 = vsel %vm252_vm12, %v687_v11, %v1634_v12 }
 0x227   :  { %v699_v13 = vpop.permute.xlu0 %698  ;;  %v1636_v14 = vpop.permute.xlu1 %650 }
 0x228   :  { %v709_v16 = vsel %vm252_vm12, %v697_v7, %v699_v13 }
 0x229   :  { %805 = vmatprep.subr.bf16.mxu1 %v709_v16 }
 0x22a   :  { %806 = vmatpush1.bf16.msra.mxu1 %v708_v33 }
 0x22b   :  { %v649_v31 = vpop.permute.xlu0 %648  ;;  %807 = vmatprep.subr.bf16.mxu1 %v705_v32  ;;  %v621_v34 = vpop.permute.xlu1 %620 }
 0x22c   :  { %v667_v2 = vsel %vm232_vm13, %v649_v31, %v1636_v14 }
 0x22e   :  { %808 = vmatpush1.bf16.msra.mxu1 %v704_v17 }
 0x22f   :  { %v1643_v24 = vpop.permute.xlu0 %660  ;;  %v619_v25 = vpop.permute.xlu1 %618 }
 0x230   :  { %v671_v15 = vsel %vm232_vm13, %v659_v9, %v1643_v24  ;;  %v632_v43 = vsel %vm212_vm14, %v619_v25, %v621_v34 }
 0x231   :  { %809 = vmatprep.subr.bf16.mxu1 %v671_v15 }
 0x232   :  { %810 = vmatpush1.bf16.msra.mxu1 %v670_v27 }
 0x233   :  { %v647_v29 = vpop.permute.xlu0 %646  ;;  %811 = vmatprep.subr.bf16.mxu1 %v667_v2  ;;  %v1650_v35 = vpop.permute.xlu1 %612 }
 0x234   :  { %v666_v3 = vsel %vm232_vm13, %v647_v29, %v649_v31 }
 0x236   :  { %812 = vmatpush1.bf16.msra.mxu1 %v666_v3 }
 0x237   :  { %v1653_v36 = vpop.permute.xlu0 %622  ;;  %v735_v0 = vpop.permute.xlu1 %734 }
 0x238   :  { %v633_v42 = vsel %vm212_vm14, %v621_v34, %v1653_v36 }
 0x239   :  { %813 = vmatprep.subr.bf16.mxu1 %v633_v42 }
 0x23a   :  { %814 = vmatpush1.bf16.msra.mxu1 %v632_v43 }
 0x23b   :  { %v611_v22 = vpop.permute.xlu0 %610  ;;  %v733_v44 = vpop.permute.xlu1 %732 }
 0x23c   :  { %v629_v19 = vsel %vm212_vm14, %v611_v22, %v1650_v35  ;;  %v746_v49 = vsel %vm272_vm11, %v733_v44, %v735_v0 }
 0x23d   :  { %815 = vmatprep.subr.bf16.mxu1 %v629_v19 }
 0x23f   :  { %v609_v23 = vpop.permute.xlu0 %608  ;;  %v1660_v63 = vpop.permute.xlu1 %726 }
 0x240   :  { %v628_v20 = vsel %vm212_vm14, %v609_v23, %v611_v22 }
 0x241   :  { %816 = vmatpush1.bf16.msra.mxu1 %v628_v20 }
 0x242   :  { %1059 = vmatprep.subr.msk.bf16.mxu1 %vm584_vm10, %v1515_v41 }
 0x243   :  { %v725_v45 = vpop.permute.xlu0 %724  ;;  %v701_v46 = vpop.permute.xlu1 %700 }
 0x245   :  { %818 = vmatpush1.bf16.msra.mxu1 %v1507_v30 }
 0x246   :  { %1060 = vmatprep.subr.msk.bf16.mxu1 %vm584_vm10, %v1471_v61  ;;  %v710_v61 = vsel %vm252_vm12, %v699_v13, %v701_v46 }
 0x247   :  { %v1670_v47 = vpop.permute.xlu0 %736  ;;  %v691_v28 = vpop.permute.xlu1 %690 }
 0x248   :  { %v747_v41 = vsel %vm272_vm11, %v735_v0, %v1670_v47  ;;  %v706_v52 = vsel %vm252_vm12, %v1634_v12, %v691_v28  ;;  %v1120_v12 = vld [vmem:[%s1783_s3 + $0x10] ss:$8 sps:$4 sm:$0xff]   ;;  %s1217_s3 = smov [#allocation9]  }
 0x249   :  { %820 = vmatpush1.bf16.msra.mxu1 %v1469_v60  ;;  %s1026_s2 = sshll.u32 %s1217_s3, 4  ;;  %s1027_s2 = int_to_ptr.vmem [resolvable:$true] %s1026_s2 }
 0x24a   :  { %831 = vmatprep.subr.bf16.mxu1 %v1378_v39  ;;  %v743_v39 = vsel %vm272_vm11, %v725_v45, %v1660_v63  ;;  %s1173_s13 = scalar_lea.vmem %s1027_s2, 2560  ;;  %p1178_p2 = scmp.lt.s32.totalorder %s1027_s2, %s1027_s2 }
 0x24b   :  { %v723_v48 = vpop.permute.xlu0 %722  ;;  %v663_v30 = vpop.permute.xlu1 %662  ;;  %p1174_p1 = scmp.ne.s32.totalorder %s1027_s2, %s1173_s13  ;;  %p1179_p3 = scmp.lt.s32.totalorder %s1173_s13, %s1173_s13 }
 0x24c   :  { %v742_v60 = vsel %vm272_vm11, %v723_v48, %v725_v45  ;;  %v672_v7 = vsel %vm232_vm13, %v1643_v24, %v663_v30 }
 0x24d   :  { %832 = vmatpush2.bf16.msra.mxu1 %v1382_v40  ;;  %p1180_p4 = por %p1179_p3, %p1178_p2 }
 0x24e   :  { %833 = vmatprep.subr.bf16.mxu1 %v747_v41 }
 0x24f   :  { %v703_v21 = vpop.permute.xlu0 %702  ;;  %v653_v54 = vpop.permute.xlu1 %652  ;;  %p1181_p5 = pnand %p1180_p4, %p1174_p1 }
 0x250   :  { %v711_v51 = vsel %vm252_vm12, %v701_v46, %v703_v21  ;;  %v668_v13 = vsel %vm232_vm13, %v1636_v14, %v653_v54 }
 0x251   :  { %834 = vmatpush2.bf16.msra.mxu1 %v746_v49  ;;  %858 = vmatprep.subr.bf16.mxu0 %v711_v51 }
 0x252   :  { %835 = vmatprep.subr.bf16.mxu1 %v743_v39  ;;  %859 = vmatpush1.bf16.msra.mxu0 %v710_v61 }
 0x253   :  { %v693_v40 = vpop.permute.xlu0 %692  ;;  %v625_v9 = vpop.permute.xlu1 %624 }
 0x254   :  { %v707_v1 = vsel %vm252_vm12, %v691_v28, %v693_v40  ;;  %v634_v32 = vsel %vm212_vm14, %v1653_v36, %v625_v9 }
 0x255   :  { %836 = vmatpush2.bf16.msra.mxu1 %v742_v60  ;;  %860 = vmatprep.subr.bf16.mxu0 %v707_v1 }
 0x256   :  { %861 = vmatpush1.bf16.msra.mxu0 %v706_v52  ;;  %911 = vmatprep.subr.bf16.mxu1 %v1211_v26 }
 0x257   :  { %v665_v58 = vpop.permute.xlu0 %664  ;;  %v615_v31 = vpop.permute.xlu1 %614 }
 0x258   :  { %838 = vmatmul.mubr.bf16.vlgmr.msra.gmra.mxu1 %v1687_v50  ;;  %v673_v5 = vsel %vm232_vm13, %v663_v30, %v665_v58  ;;  %v630_v17 = vsel %vm212_vm14, %v1650_v35, %v615_v31 }
 0x259   :  { %862 = vmatprep.subr.bf16.mxu0 %v673_v5  ;;  %912 = vmatpush1.bf16.msra.mxu1 %v703_v21 }
 0x25a   :  { %863 = vmatpush1.bf16.msra.mxu0 %v672_v7  ;;  %913 = vmatprep.subr.bf16.mxu1 %v1211_v26 }
 0x25b   :  { %v655_v8 = vpop.permute.xlu0 %654  ;;  %1062 = vmatprep.mubr.msk.bf16.mxu1 %vm798_vm1, %v1695_v59  ;;  %v739_v24 = vpop.permute.xlu1 %738 }
 0x25c   :  { %v669_v11 = vsel %vm232_vm13, %v653_v54, %v655_v8  ;;  %v748_v4 = vsel %vm272_vm11, %v1670_v47, %v739_v24 }
 0x25d   :  { %864 = vmatprep.subr.bf16.mxu0 %v669_v11  ;;  %914 = vmatpush1.bf16.msra.mxu1 %v693_v40 }
 0x25e   :  { %865 = vmatpush1.bf16.msra.mxu0 %v668_v13  ;;  %915 = vmatprep.subr.bf16.mxu1 %v1211_v26 }
 0x25f   :  { %v627_v16 = vpop.permute.xlu0 %626 }
 0x260   :  { %v635_v33 = vsel %vm212_vm14, %v625_v9, %v627_v16  ;;  %848 = vmatmul.mubr.bf16.gmra.mxu1 %v1120_v12 }
 0x261   :  { %866 = vmatprep.subr.bf16.mxu0 %v635_v33  ;;  %916 = vmatpush1.bf16.msra.mxu1 %v665_v58 }
 0x262   :  { %867 = vmatpush1.bf16.msra.mxu0 %v634_v32  ;;  %917 = vmatprep.subr.bf16.mxu1 %v1211_v26 }
 0x263   :  { %v617_v34 = vpop.permute.xlu0 %616  ;;  %1067 = vmatprep.mubr.msk.bf16.mxu1 %vm798_vm1, %v1596_v18 }
 0x264   :  { %v631_v14 = vsel %vm212_vm14, %v615_v31, %v617_v34 }
 0x265   :  { %868 = vmatprep.subr.bf16.mxu0 %v631_v14  ;;  %918 = vmatpush1.bf16.msra.mxu1 %v655_v8 }
 0x266   :  { %869 = vmatpush1.bf16.msra.mxu0 %v630_v17  ;;  %919 = vmatprep.subr.bf16.mxu1 %v1211_v26 }
 0x267   :  { %1063 = vmatprep.subr.msk.bf16.mxu0 %vm586_vm9, %v1564_v37  ;;  %v741_v18 = vpop.permute.xlu0 %740 }
 0x269   :  { %920 = vmatpush1.bf16.msra.mxu1 %v627_v16 }
 0x26a   :  { %871 = vmatpush1.bf16.msra.mxu0 %v1532_v10  ;;  %921 = vmatprep.subr.bf16.mxu1 %v1211_v26  ;;  %v749_v10 = vsel %vm272_vm11, %v739_v24, %v741_v18 }
 0x26b   :  { %1064 = vmatprep.subr.msk.bf16.mxu0 %vm586_vm9, %v1575_v38  ;;  %v731_v37 = vpop.permute.xlu0 %730  ;;  %v729_v38 = vpop.permute.xlu1 %728 }
 0x26d   :  { %922 = vmatpush1.bf16.msra.mxu1 %v617_v34 }
 0x26e   :  { %873 = vmatpush1.bf16.msra.mxu0 %v1528_v6  ;;  %923 = vmatprep.subr.bf16.mxu1 %v1211_v26  ;;  %v745_v6 = vsel %vm272_vm11, %v729_v38, %v731_v37 }
 0x26f   :  { %884 = vmatprep.subr.bf16.mxu0 %v1396_v57  ;;  %v744_v57 = vsel %vm272_vm11, %v1660_v63, %v729_v38  ;;  %vm1004_vm11 = vcmask 261120  }
 0x271   :  { %924 = vmatpush1.bf16.msra.mxu1 %v1605_v53 }
 0x272   :  { %885 = vmatpush2.bf16.msra.mxu0 %v1402_v62  ;;  %925 = vmatprep.subr.bf16.mxu1 %v1211_v26 }
 0x273   :  { %886 = vmatprep.subr.bf16.mxu0 %v749_v10 }
 0x275   :  { %926 = vmatpush1.bf16.msra.mxu1 %v1610_v55 }
 0x276   :  { %887 = vmatpush2.bf16.msra.mxu0 %v748_v4  ;;  %937 = vmatprep.subr.bf16.mxu1 %v1211_v26 }
 0x277   :  { %888 = vmatprep.subr.bf16.mxu0 %v745_v6 }
 0x278   :  { %v1752_v25 = vpop.permute.xlu0 %769 }
 0x279   :  { %938 = vmatpush2.bf16.msra.mxu1 %v1392_v56  ;;  %v766_v56 = vpop.permute.xlu1 %765 }
 0x27a   :  { %889 = vmatpush2.bf16.msra.mxu0 %v744_v57  ;;  %939 = vmatprep.subr.bf16.mxu1 %v1211_v26 }
 0x27d   :  { %891 = vmatmul.mubr.bf16.vlgmr.msra.gmra.mxu0 %v1687_v50  ;;  %940 = vmatpush2.bf16.msra.mxu1 %v741_v18  ;;  %v1754_v2 = vpop.permute.xlu1 %773 }
 0x27e   :  { %941 = vmatprep.subr.bf16.mxu1 %v1211_v26  ;;  %1066 = vmatprep.mubr.msk.bf16.mxu0 %vm798_vm1, %v1695_v59 }
 0x281   :  { %942 = vmatpush2.bf16.msra.mxu1 %v731_v37  ;;  %v1759_v20 = vpop.permute.xlu1 %777 }
 0x284   :  { %944 = vmatmul.mubr.bf16.vlgmr.msra.gmra.mxu1 %v1687_v50 }
 0x285   :  { %901 = vmatmul.mubr.bf16.gmra.mxu0 %v1120_v12  ;;  %1068 = vmatprep.mubr.msk.bf16.mxu1 %vm798_vm1, %v1695_v59 }
 0x28c   :  { %952 = vmatmul.mubr.bf16.gmra.mxu1 %v1120_v12 }
 0x318   :  { %v839_v62 = vpop.f32.mrf.mxu1 }
 0x319   :  { %v840_v53 = vadd.f32 %v839_v62, %v766_v56 }
 0x31a   :  { %v841_v55 = vpop.f32.mrf.mxu1 }
 0x31b   :  { %v960_v15 = vmax.f32 %v840_v53, 0.0  ;;  %v842_v27 = vadd.f32 %v841_v55, %v766_v56 }
 0x31c   :  { %v843_v26 = vpop.f32.mrf.mxu1 }
 0x31d   :  { %v980_v29 = vmin.f32 %v960_v15, 20.0  ;;  %v961_v35 = vmax.f32 %v842_v27, 0.0  ;;  %v844_v3 = vadd.f32 %v843_v26, %v1752_v25 }
 0x31e   :  { %v845_v36 = vpop.f32.mrf.mxu1 }
 0x31f   :  { %1000 = vst [vmem:[#allocation9] sm:$0xff] %v980_v29  ;;  %v981_v0 = vmin.f32 %v961_v35, 20.0  ;;  %v965_v42 = vmax.f32 %v844_v3, 0.0  ;;  %v846_v43 = vadd.f32 %v845_v36, %v1752_v25 }
 0x320   :  { %v849_v22 = vpop.f32.mrf.mxu1 }
 0x321   :  { %1001 = vst [vmem:[#allocation9 + $0x8] sm:$0xff] %v981_v0  ;;  %v985_v44 = vmin.f32 %v965_v42, 20.0  ;;  %v966_v19 = vmax.f32 %v846_v43, 0.0  ;;  %v850_v23 = vadd.f32 %v849_v22, %v1754_v2 }
 0x322   :  { %v851_v63 = vpop.f32.mrf.mxu1 }
 0x323   :  { %1006 = vst [vmem:[#allocation9 + $0x28] sm:$0xff] %v985_v44  ;;  %v986_v45 = vmin.f32 %v966_v19, 20.0  ;;  %v852_v46 = vadd.f32 %v851_v63, %v1754_v2  ;;  %v970_v47 = vmax.f32 %v850_v23, 0.0 }
 0x324   :  { %v853_v28 = vpop.f32.mrf.mxu1 }
 0x325   :  { %1007 = vst [vmem:[#allocation9 + $0x30] sm:$0xff] %v986_v45  ;;  %v971_v48 = vmax.f32 %v852_v46, 0.0  ;;  %v990_v41 = vmin.f32 %v970_v47, 20.0  ;;  %v854_v21 = vadd.f32 %v853_v28, %v1759_v20 }
 0x326   :  { %v855_v30 = vpop.f32.mrf.mxu1 }
 0x327   :  { %v991_v49 = vmin.f32 %v971_v48, 20.0  ;;  %1011 = vst [vmem:[#allocation9 + $0x50] sm:$0xff] %v990_v41  ;;  %v856_v51 = vadd.f32 %v855_v30, %v1759_v20  ;;  %v975_v61 = vmax.f32 %v854_v21, 0.0 }
 0x329   :  { %1012 = vst [vmem:[#allocation9 + $0x58] sm:$0xff] %v991_v49  ;;  %v976_v39 = vmax.f32 %v856_v51, 0.0  ;;  %v995_v40 = vmin.f32 %v975_v61, 20.0 }
 0x32b   :  { %v996_v60 = vmin.f32 %v976_v39, 20.0  ;;  %1016 = vst [vmem:[#allocation9 + $0x78] sm:$0xff] %v995_v40 }
 0x32d   :  { %1017 = vst [vmem:[#allocation9 + $0x80] sm:$0xff] %v996_v60 }
 0x33d   :  { %v892_v1 = vpop.f32.mrf.mxu0 }
 0x33e   :  { %v893_v50 = vadd.f32 %v892_v1, %v766_v56 }
 0x33f   :  { %v894_v52 = vpop.f32.mrf.mxu0 }
 0x340   :  { %v962_v54 = vmax.f32 %v893_v50, 0.0  ;;  %v895_v58 = vadd.f32 %v894_v52, %v766_v56 }
 0x341   :  { %v896_v59 = vpop.f32.mrf.mxu0 }
 0x342   :  { %v982_v5 = vmin.f32 %v962_v54, 20.0  ;;  %v963_v7 = vmax.f32 %v895_v58, 0.0  ;;  %v897_v8 = vadd.f32 %v896_v59, %v1752_v25 }
 0x343   :  { %v898_v9 = vpop.f32.mrf.mxu0 }
 0x344   :  { %1002 = vst [vmem:[#allocation9 + $0x10] sm:$0xff] %v982_v5  ;;  %v983_v11 = vmin.f32 %v963_v7, 20.0  ;;  %v967_v12 = vmax.f32 %v897_v8, 0.0  ;;  %v899_v13 = vadd.f32 %v898_v9, %v1752_v25  ;;  %v945_v16 = vpop.f32.mrf.mxu1 }
 0x345   :  { %v946_v33 = vadd.f32 %v945_v16, %v766_v56  ;;  %v902_v32 = vpop.f32.mrf.mxu0 }
 0x346   :  { %1003 = vst [vmem:[#allocation9 + $0x18] sm:$0xff] %v983_v11  ;;  %v987_v31 = vmin.f32 %v967_v12, 20.0  ;;  %v968_v34 = vmax.f32 %v899_v13, 0.0  ;;  %v903_v14 = vadd.f32 %v902_v32, %v1754_v2  ;;  %v947_v17 = vpop.f32.mrf.mxu1 }
 0x347   :  { %v964_v18 = vmax.f32 %v946_v33, 0.0  ;;  %v904_v24 = vpop.f32.mrf.mxu0 }
 0x348   :  { %1008 = vst [vmem:[#allocation9 + $0x38] sm:$0xff] %v987_v31  ;;  %v988_v10 = vmin.f32 %v968_v34, 20.0  ;;  %v972_v37 = vmax.f32 %v903_v14, 0.0  ;;  %v905_v4 = vadd.f32 %v904_v24, %v1754_v2  ;;  %v948_v38 = vpop.f32.mrf.mxu1 }
 0x349   :  { %v984_v6 = vmin.f32 %v964_v18, 20.0  ;;  %v949_v57 = vadd.f32 %v948_v38, %v1752_v25  ;;  %v906_v56 = vpop.f32.mrf.mxu0 }
 0x34a   :  { %1009 = vst [vmem:[#allocation9 + $0x40] sm:$0xff] %v988_v10  ;;  %v992_v62 = vmin.f32 %v972_v37, 20.0  ;;  %v973_v53 = vmax.f32 %v905_v4, 0.0  ;;  %v907_v55 = vadd.f32 %v906_v56, %v1759_v20  ;;  %v950_v15 = vpop.f32.mrf.mxu1 }
 0x34b   :  { %1005 = vst.msk [vmem:[#allocation9 + $0x20] sm:$0xff] %vm1004_vm11, %v984_v6  ;;  %v969_v27 = vmax.f32 %v949_v57, 0.0  ;;  %v908_v26 = vpop.f32.mrf.mxu0 }
 0x34c   :  { %1013 = vst [vmem:[#allocation9 + $0x60] sm:$0xff] %v992_v62  ;;  %v993_v29 = vmin.f32 %v973_v53, 20.0  ;;  %v977_v35 = vmax.f32 %v907_v55, 0.0  ;;  %v909_v3 = vadd.f32 %v908_v26, %v1759_v20  ;;  %v953_v36 = vpop.f32.mrf.mxu1 }
 0x34d   :  { %v989_v0 = vmin.f32 %v969_v27, 20.0  ;;  %v954_v25 = vadd.f32 %v953_v36, %v1754_v2 }
 0x34e   :  { %1014 = vst [vmem:[#allocation9 + $0x68] sm:$0xff] %v993_v29  ;;  %v997_v42 = vmin.f32 %v977_v35, 20.0  ;;  %v978_v43 = vmax.f32 %v909_v3, 0.0  ;;  %v955_v22 = vpop.f32.mrf.mxu1 }
 0x34f   :  { %1010 = vst.msk [vmem:[#allocation9 + $0x48] sm:$0xff] %vm1004_vm11, %v989_v0  ;;  %v974_v44 = vmax.f32 %v954_v25, 0.0 }
 0x350   :  { %1018 = vst [vmem:[#allocation9 + $0x88] sm:$0xff] %v997_v42  ;;  %v998_v19 = vmin.f32 %v978_v43, 20.0  ;;  %v956_v23 = vpop.f32.mrf.mxu1 }
 0x351   :  { %v994_v63 = vmin.f32 %v974_v44, 20.0  ;;  %v957_v45 = vadd.f32 %v956_v23, %v1759_v20 }
 0x352   :  { %1019 = vst [vmem:[#allocation9 + $0x90] sm:$0xff] %v998_v19  ;;  %v958_v46 = vpop.f32.mrf.mxu1 }
 0x353   :  { %1015 = vst.msk [vmem:[#allocation9 + $0x70] sm:$0xff] %vm1004_vm11, %v994_v63  ;;  %v979_v2 = vmax.f32 %v957_v45, 0.0 }
 0x355   :  { %v999_v47 = vmin.f32 %v979_v2, 20.0 }
 0x357   :  { %1020 = vst.msk [vmem:[#allocation9 + $0x98] sm:$0xff] %vm1004_vm11, %v999_v47 }
 0x358   :  { %1184 = shalt.err (!%p1181_p5)
}
 0x359   :  { %s1218_s14 = smov 640   ;;  %s1219_s15 = smov 40  }
 0x35a   :  { %1032 = dma.vmem_to_hbm [thread:$0]  %s1027_s2, 2560, %s1785_s5, [#allocation6], %s1218_s14, %s1218_s14, %s1219_s15  }
 0x35b   :  { %1199 = dma.done.wait [#allocation6], 2560  }
 0x35c   :  { %1200 = vsyncadd [#allocation6], 4294964736 }
 0x35d   :  { %1036 = vsyncpa [#allocation5], 1 }
 0x35e   :  { %1037 = vsyncpa [#allocation8], 1 }
 0x35f   :  { %1038 = vsyncpa [#allocation6], 1 }

</bundles_post_ra>
